<compile_context>
chip_gen: v7x
topology: tpu7x:2x2x1
jax: 0.10.0
libtpu: 0.0.40
codegen_flags: <defaults>
</compile_context>

<pallas_src>
import functools

import numpy as np
import jax
import jax.numpy as jnp
from jax.experimental import pallas as pl
from jax.experimental.pallas import tpu as pltpu

# ----------------------- synthetic DetectorContext ----------------------- #
NUM_ANCHORS = 2
NUM_CLASSES = 3
LAMBDA_OBJ = 5.0
LAMBDA_NOOBJ = 1.0
LAMBDA_COORD = 1.0
IOU_THRESHOLD = 0.6
# Deterministic PriorBox anchors: (w, h) normalized to image size, shape (A, 2)
ANCHOR_WH = np.array([[0.15, 0.20], [0.40, 0.45]], dtype=np.float32)


# ----------------------------- Pallas kernel ----------------------------- #
def _yolov2_loss_kernel(pred_ref, tgt_ref, out_ref, acc_ref, *,
                        l_obj, l_noobj, l_coord):
    """One (ba_tile, 5+C, HW) block: activations + masked per-field squared
    errors accumulated element-wise into a (5+C, HW) VMEM scratch."""
    step = pl.program_id(1)          # reduction ("arbitrary") axis

    @pl.when(step == 0)
    def _init():
        acc_ref[...] = jnp.zeros_like(acc_ref)

    p = pred_ref[...].astype(jnp.float32)   # (ba_tile, 5+C, HW)
    t = tgt_ref[...].astype(jnp.float32)    # (ba_tile, 8,   HW)
    d = p.shape[1]

    # activations: sigmoid on (x, y, conf), softmax over class logits (axis 1)
    xy = jax.nn.sigmoid(p[:, 0:2, :])
    wh = p[:, 2:4, :]
    conf = jax.nn.sigmoid(p[:, 4:5, :])
    logits = p[:, 5:, :]
    m = jnp.max(logits, axis=1, keepdims=True)
    e = jnp.exp(logits - m)
    probs = e * pl.reciprocal(jnp.sum(e, axis=1, keepdims=True), approx=True)

    level = t[:, 6:7, :]
    neg = (level == 0.0).astype(jnp.float32)   # negative anchors
    pos = (level == 1.0).astype(jnp.float32)   # best-matched anchors
    # level == 2 (over-threshold, non-best) and padded rows (level == -1)
    # contribute to no loss term.

    cls_idx = t[:, 4:5, :].astype(jnp.int32)
    iota = jax.lax.broadcasted_iota(jnp.int32, probs.shape, 1)
    onehot = jnp.where(iota == cls_idx, 1.0, 0.0)

    # per-element weighted squared errors (pure VPU/EUP work)
    e_xy = l_coord * pos * (xy - t[:, 0:2, :]) ** 2
    e_wh = l_coord * pos * (wh - t[:, 2:4, :]) ** 2
    e_cf = l_obj * pos * (conf - t[:, 5:6, :]) ** 2 + l_noobj * neg * conf * conf
    e_cl = pos * (probs - onehot) ** 2

    # fold the batch*anchor tile axis (leading axis => elementwise adds, no XLU)
    acc_ref[0:2, :] += jnp.sum(e_xy, axis=0)
    acc_ref[2:4, :] += jnp.sum(e_wh, axis=0)
    acc_ref[4:5, :] += jnp.sum(e_cf, axis=0)
    acc_ref[5:d, :] += jnp.sum(e_cl, axis=0)

    @pl.when(step == pl.num_programs(1) - 1)
    def _final():
        total = jnp.sum(acc_ref[...])                    # single reduce, once
        out_ref[...] = jnp.broadcast_to(total, out_ref.shape)


def yolov2_loss_pallas(pred_cm, target_cm, *, l_obj, l_noobj, l_coord,
                       ba_tile=256, num_shards=2):
    """pred_cm: (B*A, 5+C, H*W) f32; target_cm: (B*A, 8, H*W) f32."""
    ba, d, hw = pred_cm.shape
    _, tf, _ = target_cm.shape

    ba_tile = max(1, min(ba_tile, pl.cdiv(ba, num_shards)))
    chunk = ba_tile * num_shards
    ba_pad = pl.cdiv(ba, chunk) * chunk
    if ba_pad != ba:
        pad = ba_pad - ba
        pred_cm = jnp.pad(pred_cm, ((0, pad), (0, 0), (0, 0)))
        # level = -1 rows contribute to no loss term
        target_cm = jnp.pad(target_cm, ((0, pad), (0, 0), (0, 0)),
                            constant_values=-1.0)
    tiles_per_shard = ba_pad // chunk
    grid = (num_shards, tiles_per_shard)

    kernel = functools.partial(_yolov2_loss_kernel,
                               l_obj=l_obj, l_noobj=l_noobj, l_coord=l_coord)
    out = pl.pallas_call(
        kernel,
        # one lane-dense partial-sum block per parallel shard (v7x megacore)
        out_shape=jax.ShapeDtypeStruct((num_shards, 8, 128), jnp.float32),
        grid_spec=pltpu.PrefetchScalarGridSpec(
            num_scalar_prefetch=0,
            grid=grid,
            in_specs=[
                pl.BlockSpec((ba_tile, d, hw),
                             lambda c, i: (c * tiles_per_shard + i, 0, 0)),
                pl.BlockSpec((ba_tile, tf, hw),
                             lambda c, i: (c * tiles_per_shard + i, 0, 0)),
            ],
            out_specs=pl.BlockSpec((1, 8, 128), lambda c, i: (c, 0, 0)),
            scratch_shapes=[pltpu.VMEM((d, hw), jnp.float32)],
        ),
        compiler_params=pltpu.CompilerParams(
            dimension_semantics=("parallel", "arbitrary"),
            vmem_limit_bytes=48 * 1024 * 1024,   # safe on v5e/v6e/v7x
        ),
    )(pred_cm, target_cm)
    # sum the per-shard partials (one TensorCore each on v7x)
    return jnp.sum(out[:, 0, 0])


# --------------------- host-side glue (match / targets) ------------------- #
# TODO(synk): the per-image ragged GT<->anchor matching (`match`,
# `build_flatten_targets`) is inherently data-dependent / ragged; kept as
# numpy glue.  `calc_prior_loss` (seen < 12800) is not invoked by forward().
def _cxcywh_to_xyxy(b):
    cx, cy, w, h = b[:, 0], b[:, 1], b[:, 2], b[:, 3]
    return np.stack([cx - w / 2, cy - h / 2, cx + w / 2, cy + h / 2], 1)


def _box_iou(a, b):
    area_a = (a[:, 2] - a[:, 0]) * (a[:, 3] - a[:, 1])
    area_b = (b[:, 2] - b[:, 0]) * (b[:, 3] - b[:, 1])
    lt = np.maximum(a[:, None, :2], b[None, :, :2])
    rb = np.minimum(a[:, None, 2:], b[None, :, 2:])
    wh = np.clip(rb - lt, 0.0, None)
    inter = wh[..., 0] * wh[..., 1]
    return inter / (area_a[:, None] + area_b[None, :] - inter)


def build_flatten_targets(gt, grid_shape):
    """-> rows (dx, dy, gx, gy, w, h, cls), spans (boxes per image)."""
    grid_y, grid_x = grid_shape
    rows, spans = [], []
    for boxes in gt:
        spans.append(len(boxes))
        for (cx, cy, w, h, c) in boxes:
            gx = min(int(np.floor(cx * grid_x)), grid_x - 1)
            gy = min(int(np.floor(cy * grid_y)), grid_y - 1)
            rows.append([cx - gx / grid_x, cy - gy / grid_y, gx, gy, w, h, c])
    if not rows:
        return np.zeros((0, 7), np.float32), spans
    return np.asarray(rows, np.float32), spans


def _encode(gt_rows, anchors):
    return np.concatenate(
        [gt_rows[:, :2], np.log(gt_rows[:, 4:6]) - np.log(anchors[:, 2:])], -1)


def match(gt_batch, spans, grid_x, grid_y):
    """-> (B, A*grid_y*grid_x, 7): dx, dy, ln(w/aw), ln(h/ah), cls, iou, level."""
    a = NUM_ANCHORS
    # generate_grid_train(..., center=True): cell-center (x, y) coordinates
    xs = (np.arange(grid_x) + 0.5) / grid_x
    ys = (np.arange(grid_y) + 0.5) / grid_y
    gx, gy = np.meshgrid(xs, ys)                       # (grid_y, grid_x)
    centers = np.stack([gx, gy], -1).reshape(-1, 2)    # (gy*gx, 2), y-major
    centers = np.tile(centers, (a, 1))                 # (A*gy*gx, 2)
    anch_wh = np.repeat(ANCHOR_WH, grid_y * grid_x, axis=0)
    anchors = np.concatenate([centers, anch_wh], -1).astype(np.float32)

    num_boxes = grid_x * grid_y * a
    if gt_batch.shape[0] > 0:
        gts = np.concatenate([gt_batch[:, :2], gt_batch[:, 4:6]], 1).copy()
        gts[:, 0] += gt_batch[:, 2] / grid_x
        gts[:, 1] += gt_batch[:, 3] / grid_y
        ious = _box_iou(_cxcywh_to_xyxy(gts), _cxcywh_to_xyxy(anchors))
    else:
        ious = np.zeros((0, num_boxes), np.float32)

    targets, offset = [], 0
    for span in spans:
        placeholder = np.zeros((num_boxes, 7), np.float32)
        if span > 0:
            iou = ious[offset:offset + span]
            g = gt_batch[offset:offset + span]
            best_gt_overlap = iou.max(0)
            best_gt_idx = iou.argmax(0)
            ot = best_gt_overlap > IOU_THRESHOLD
            gi = best_gt_idx[ot]
            placeholder[ot] = np.concatenate(
                [_encode(g[gi, :6], anchors[ot]), g[gi, 6:7],
                 iou[gi, ot][:, None],
                 np.full((gi.shape[0], 1), 2.0, np.float32)], 1)
            best_prior_idx = iou.argmax(1)
            placeholder[best_prior_idx] = np.concatenate(
                [_encode(g[:, :6], anchors[best_prior_idx]), g[:, 6:7],
                 iou[np.arange(span), best_prior_idx][:, None],
                 np.ones((span, 1), np.float32)], 1)
        targets.append(placeholder)
        offset += span
    return np.stack(targets, 0)


# --------------------------- numpy reference ------------------------------ #
def reference_loss(pred_flat, target_flat):
    p = np.asarray(pred_flat, np.float64)
    t = np.asarray(target_flat, np.float64)
    xy = 1.0 / (1.0 + np.exp(-p[:, 0:2]))
    wh = p[:, 2:4]
    conf = 1.0 / (1.0 + np.exp(-p[:, 4]))
    logits = p[:, 5:]
    e = np.exp(logits - logits.max(-1, keepdims=True))
    probs = e / e.sum(-1, keepdims=True)
    neg = t[:, 6] == 0
    pos = t[:, 6] == 1
    noobj = np.sum(conf[neg] ** 2)
    coord = np.sum((np.concatenate([xy, wh], 1)[pos] - t[pos, :4]) ** 2)
    obj = np.sum((conf[pos] - t[pos, 5]) ** 2)
    onehot = np.eye(NUM_CLASSES)[t[pos, 4].astype(np.int64)]
    cls = np.sum((probs[pos] - onehot) ** 2)
    return cls + LAMBDA_NOOBJ * noobj + LAMBDA_OBJ * obj + LAMBDA_COORD * coord


# --------------------------------- main ----------------------------------- #
if __name__ == "__main__":
    B = 2
    H, W = 16, 16                     # grid_y, grid_x (H*W = 256: lane-dense)
    D = 5 + NUM_CLASSES               # 8

    key = jax.random.PRNGKey(0)
    pred = 0.5 * jax.random.normal(key, (B, NUM_ANCHORS * D, H, W),
                                   dtype=jnp.float32)   # NCHW, like PyTorch

    # groundtruth: per image list of (cx, cy, w, h, class), normalized
    gt = [
        [[0.30, 0.40, 0.20, 0.30, 1], [0.70, 0.60, 0.40, 0.50, 2]],
        [[0.50, 0.50, 0.25, 0.25, 0]],
    ]

    gt_batch, spans = build_flatten_targets(gt, (H, W))
    target = match(gt_batch, spans, W, H)                  # (B, A*H*W, 7)

    # channel-major target: (B*A, 8, H*W) (7 fields padded to 8), host-side
    tgt_cm = target.reshape(B, NUM_ANCHORS, H * W, 7).transpose(0, 1, 3, 2)
    tgt_cm = tgt_cm.reshape(B * NUM_ANCHORS, 7, H * W)
    tgt_cm = np.concatenate(
        [tgt_cm, np.zeros((B * NUM_ANCHORS, 1, H * W), np.float32)], axis=1)
    tgt_cm = jnp.asarray(tgt_cm, jnp.float32)

    # channel-major pred: pure reshape of NCHW (no transpose / HBM copy)
    pred_cm = jnp.reshape(pred, (B * NUM_ANCHORS, D, H * W))

    loss = yolov2_loss_pallas(pred_cm, tgt_cm,
                              l_obj=LAMBDA_OBJ, l_noobj=LAMBDA_NOOBJ,
                              l_coord=LAMBDA_COORD)
    loss = jax.block_until_ready(loss)

    # reference on the PyTorch-equivalent flat (N, 5+C) layout
    pred_flat_np = np.asarray(pred_cm).transpose(0, 2, 1).reshape(-1, D)
    tgt_flat_np = np.asarray(tgt_cm)[:, :7, :].transpose(0, 2, 1).reshape(-1, 7)
    ref = reference_loss(pred_flat_np, tgt_flat_np)
    np.testing.assert_allclose(float(loss), float(ref), rtol=2e-3, atol=1e-2)
    print("KERNEL_OK")
</pallas_src>

<mosaic_0001>
module attributes {stable_mosaic.version = 11 : i64} {
  func.func @_yolov2_loss_kernel(%arg0: i32, %arg1: i32, %arg2: memref<2x8x256xf32, #tpu.memory_space<vmem>>, %arg3: memref<2x8x256xf32, #tpu.memory_space<vmem>>, %arg4: memref<1x8x128xf32, #tpu.memory_space<vmem>>, %arg5: memref<8x256xf32, #tpu.memory_space<vmem>>) attributes {dimension_semantics = [#tpu.dimension_semantics<parallel>, #tpu.dimension_semantics<arbitrary>], iteration_bounds = array<i64: 2, 1>, scalar_prefetch = 0 : i64, scratch_operands = 1 : i64, tpu.core_type = #tpu.core_type<tc>, window_params = [{transform_indices = @transform_0, window_bounds = array<i64: 2, 8, 256>}, {transform_indices = @transform_1, window_bounds = array<i64: 2, 8, 256>}, {transform_indices = @transform_2, window_bounds = array<i64: 1, 8, 128>}]} {
    %c0_i32 = arith.constant 0 : i32
    %0 = arith.cmpi eq, %arg1, %c0_i32 : i32
    %1 = arith.extui %0 : i1 to i32
    %c0_i32_0 = arith.constant 0 : i32
    %2 = arith.cmpi ne, %1, %c0_i32_0 : i32
    scf.if %2 {
      %cst_36 = arith.constant 0.000000e+00 : f32
      %94 = vector.broadcast %cst_36 : f32 to vector<8x256xf32>
      %c0_37 = arith.constant 0 : index
      %c0_38 = arith.constant 0 : index
      %95 = vector.load %arg5[%c0_37, %c0_38] : memref<8x256xf32, #tpu.memory_space<vmem>>, vector<8x256xf32>
      tpu.vector_store %arg5[%c0_37, %c0_38], %94 {strides = array<i32>} : memref<8x256xf32, #tpu.memory_space<vmem>>, vector<8x256xf32>,
    } else {
    }
    %c0 = arith.constant 0 : index
    %c0_1 = arith.constant 0 : index
    %c0_2 = arith.constant 0 : index
    %3 = vector.load %arg2[%c0, %c0_1, %c0_2] : memref<2x8x256xf32, #tpu.memory_space<vmem>>, vector<2x8x256xf32>
    %c0_3 = arith.constant 0 : index
    %c0_4 = arith.constant 0 : index
    %c0_5 = arith.constant 0 : index
    %4 = vector.load %arg3[%c0_3, %c0_4, %c0_5] : memref<2x8x256xf32, #tpu.memory_space<vmem>>, vector<2x8x256xf32>
    %5 = vector.extract_strided_slice %3 {offsets = [0, 0, 0], sizes = [2, 2, 256], strides = [1, 1, 1]} : vector<2x8x256xf32> to vector<2x2x256xf32>
    %6 = arith.negf %5 : vector<2x2x256xf32>
    %7 = math.exp %6 : vector<2x2x256xf32>
    %cst = arith.constant 1.000000e+00 : f32
    %8 = vector.broadcast %cst : f32 to vector<2x2x256xf32>
    %9 = arith.addf %8, %7 : vector<2x2x256xf32>
    %10 = arith.divf %8, %9 : vector<2x2x256xf32>
    %11 = vector.extract_strided_slice %3 {offsets = [0, 2, 0], sizes = [2, 2, 256], strides = [1, 1, 1]} : vector<2x8x256xf32> to vector<2x2x256xf32>
    %12 = vector.extract_strided_slice %3 {offsets = [0, 4, 0], sizes = [2, 1, 256], strides = [1, 1, 1]} : vector<2x8x256xf32> to vector<2x1x256xf32>
    %13 = arith.negf %12 : vector<2x1x256xf32>
    %14 = math.exp %13 : vector<2x1x256xf32>
    %cst_6 = arith.constant 1.000000e+00 : f32
    %15 = vector.broadcast %cst_6 : f32 to vector<2x1x256xf32>
    %16 = arith.addf %15, %14 : vector<2x1x256xf32>
    %17 = arith.divf %15, %16 : vector<2x1x256xf32>
    %18 = vector.extract_strided_slice %3 {offsets = [0, 5, 0], sizes = [2, 3, 256], strides = [1, 1, 1]} : vector<2x8x256xf32> to vector<2x3x256xf32>
    %cst_7 = arith.constant dense<0xFF800000> : vector<2x256xf32>
    %19 = vector.multi_reduction <maximumf>, %18, %cst_7 [1] : vector<2x3x256xf32> to vector<2x256xf32>
    %20 = vector.shape_cast %19 : vector<2x256xf32> to vector<2x1x256xf32>
    %21 = vector.broadcast %20 : vector<2x1x256xf32> to vector<2x3x256xf32>
    %22 = arith.subf %18, %21 : vector<2x3x256xf32>
    %23 = math.exp %22 : vector<2x3x256xf32>
    %cst_8 = arith.constant dense<0.000000e+00> : vector<2x256xf32>
    %24 = vector.multi_reduction <add>, %23, %cst_8 [1] : vector<2x3x256xf32> to vector<2x256xf32>
    %25 = vector.shape_cast %24 : vector<2x256xf32> to vector<2x1x256xf32>
    %26 = tpu.reciprocal %25 {approx = true} : vector<2x1x256xf32> -> vector<2x1x256xf32>
    %27 = vector.broadcast %26 : vector<2x1x256xf32> to vector<2x3x256xf32>
    %28 = arith.mulf %23, %27 : vector<2x3x256xf32>
    %29 = vector.extract_strided_slice %4 {offsets = [0, 6, 0], sizes = [2, 1, 256], strides = [1, 1, 1]} : vector<2x8x256xf32> to vector<2x1x256xf32>
    %cst_9 = arith.constant 0.000000e+00 : f32
    %30 = vector.broadcast %cst_9 : f32 to vector<2x1x256xf32>
    %31 = arith.cmpf oeq, %29, %30 : vector<2x1x256xf32>
    %32 = arith.extui %31 : vector<2x1x256xi1> to vector<2x1x256xi32>
    %33 = arith.sitofp %32 : vector<2x1x256xi32> to vector<2x1x256xf32>
    %cst_10 = arith.constant 1.000000e+00 : f32
    %34 = vector.broadcast %cst_10 : f32 to vector<2x1x256xf32>
    %35 = arith.cmpf oeq, %29, %34 : vector<2x1x256xf32>
    %36 = arith.extui %35 : vector<2x1x256xi1> to vector<2x1x256xi32>
    %37 = arith.sitofp %36 : vector<2x1x256xi32> to vector<2x1x256xf32>
    %38 = vector.extract_strided_slice %4 {offsets = [0, 4, 0], sizes = [2, 1, 256], strides = [1, 1, 1]} : vector<2x8x256xf32> to vector<2x1x256xf32>
    %39 = arith.fptosi %38 : vector<2x1x256xf32> to vector<2x1x256xi32>
    %40 = tpu.iota {dimensions = array<i32: 1>} : vector<2x3x256xi32>
    %41 = vector.broadcast %39 : vector<2x1x256xi32> to vector<2x3x256xi32>
    %42 = arith.cmpi eq, %40, %41 : vector<2x3x256xi32>
    %cst_11 = arith.constant 1.000000e+00 : f32
    %cst_12 = arith.constant 0.000000e+00 : f32
    %43 = vector.broadcast %cst_11 : f32 to vector<2x3x256xf32>
    %44 = vector.broadcast %cst_12 : f32 to vector<2x3x256xf32>
    %45 = arith.select %42, %43, %44 : vector<2x3x256xi1>, vector<2x3x256xf32>
    %cst_13 = arith.constant 1.000000e+00 : f32
    %46 = vector.broadcast %cst_13 : f32 to vector<2x1x256xf32>
    %47 = arith.mulf %46, %37 : vector<2x1x256xf32>
    %48 = vector.extract_strided_slice %4 {offsets = [0, 0, 0], sizes = [2, 2, 256], strides = [1, 1, 1]} : vector<2x8x256xf32> to vector<2x2x256xf32>
    %49 = arith.subf %10, %48 : vector<2x2x256xf32>
    %50 = arith.mulf %49, %49 : vector<2x2x256xf32>
    %51 = vector.broadcast %47 : vector<2x1x256xf32> to vector<2x2x256xf32>
    %52 = arith.mulf %51, %50 : vector<2x2x256xf32>
    %cst_14 = arith.constant 1.000000e+00 : f32
    %53 = vector.broadcast %cst_14 : f32 to vector<2x1x256xf32>
    %54 = arith.mulf %53, %37 : vector<2x1x256xf32>
    %55 = vector.extract_strided_slice %4 {offsets = [0, 2, 0], sizes = [2, 2, 256], strides = [1, 1, 1]} : vector<2x8x256xf32> to vector<2x2x256xf32>
    %56 = arith.subf %11, %55 : vector<2x2x256xf32>
    %57 = arith.mulf %56, %56 : vector<2x2x256xf32>
    %58 = vector.broadcast %54 : vector<2x1x256xf32> to vector<2x2x256xf32>
    %59 = arith.mulf %58, %57 : vector<2x2x256xf32>
    %cst_15 = arith.constant 5.000000e+00 : f32
    %60 = vector.broadcast %cst_15 : f32 to vector<2x1x256xf32>
    %61 = arith.mulf %60, %37 : vector<2x1x256xf32>
    %62 = vector.extract_strided_slice %4 {offsets = [0, 5, 0], sizes = [2, 1, 256], strides = [1, 1, 1]} : vector<2x8x256xf32> to vector<2x1x256xf32>
    %63 = arith.subf %17, %62 : vector<2x1x256xf32>
    %64 = arith.mulf %63, %63 : vector<2x1x256xf32>
    %65 = arith.mulf %61, %64 : vector<2x1x256xf32>
    %cst_16 = arith.constant 1.000000e+00 : f32
    %66 = vector.broadcast %cst_16 : f32 to vector<2x1x256xf32>
    %67 = arith.mulf %66, %33 : vector<2x1x256xf32>
    %68 = arith.mulf %67, %17 : vector<2x1x256xf32>
    %69 = arith.mulf %68, %17 : vector<2x1x256xf32>
    %70 = arith.addf %65, %69 : vector<2x1x256xf32>
    %71 = arith.subf %28, %45 : vector<2x3x256xf32>
    %72 = arith.mulf %71, %71 : vector<2x3x256xf32>
    %73 = vector.broadcast %37 : vector<2x1x256xf32> to vector<2x3x256xf32>
    %74 = arith.mulf %73, %72 : vector<2x3x256xf32>
    %c0_17 = arith.constant 0 : index
    %c0_18 = arith.constant 0 : index
    %75 = vector.load %arg5[%c0_17, %c0_18] : memref<8x256xf32, #tpu.memory_space<vmem>>, vector<2x256xf32>
    %cst_19 = arith.constant dense<0.000000e+00> : vector<2x256xf32>
    %76 = vector.multi_reduction <add>, %52, %cst_19 [0] : vector<2x2x256xf32> to vector<2x256xf32>
    %77 = arith.addf %75, %76 : vector<2x256xf32>
    %c0_20 = arith.constant 0 : index
    %c0_21 = arith.constant 0 : index
    %78 = vector.load %arg5[%c0_20, %c0_21] : memref<8x256xf32, #tpu.memory_space<vmem>>, vector<2x256xf32>
    tpu.vector_store %arg5[%c0_20, %c0_21], %77 {strides = array<i32>} : memref<8x256xf32, #tpu.memory_space<vmem>>, vector<2x256xf32>,
    %c2 = arith.constant 2 : index
    %c0_22 = arith.constant 0 : index
    %79 = vector.load %arg5[%c2, %c0_22] : memref<8x256xf32, #tpu.memory_space<vmem>>, vector<2x256xf32>
    %cst_23 = arith.constant dense<0.000000e+00> : vector<2x256xf32>
    %80 = vector.multi_reduction <add>, %59, %cst_23 [0] : vector<2x2x256xf32> to vector<2x256xf32>
    %81 = arith.addf %79, %80 : vector<2x256xf32>
    %c2_24 = arith.constant 2 : index
    %c0_25 = arith.constant 0 : index
    %82 = vector.load %arg5[%c2_24, %c0_25] : memref<8x256xf32, #tpu.memory_space<vmem>>, vector<2x256xf32>
    tpu.vector_store %arg5[%c2_24, %c0_25], %81 {strides = array<i32>} : memref<8x256xf32, #tpu.memory_space<vmem>>, vector<2x256xf32>,
    %c4 = arith.constant 4 : index
    %c0_26 = arith.constant 0 : index
    %83 = vector.load %arg5[%c4, %c0_26] : memref<8x256xf32, #tpu.memory_space<vmem>>, vector<1x256xf32>
    %cst_27 = arith.constant dense<0.000000e+00> : vector<1x256xf32>
    %84 = vector.multi_reduction <add>, %70, %cst_27 [0] : vector<2x1x256xf32> to vector<1x256xf32>
    %85 = arith.addf %83, %84 : vector<1x256xf32>
    %c4_28 = arith.constant 4 : index
    %c0_29 = arith.constant 0 : index
    %86 = vector.load %arg5[%c4_28, %c0_29] : memref<8x256xf32, #tpu.memory_space<vmem>>, vector<1x256xf32>
    tpu.vector_store %arg5[%c4_28, %c0_29], %85 {strides = array<i32>} : memref<8x256xf32, #tpu.memory_space<vmem>>, vector<1x256xf32>,
    %c5 = arith.constant 5 : index
    %c0_30 = arith.constant 0 : index
    %87 = vector.load %arg5[%c5, %c0_30] : memref<8x256xf32, #tpu.memory_space<vmem>>, vector<3x256xf32>
    %cst_31 = arith.constant dense<0.000000e+00> : vector<3x256xf32>
    %88 = vector.multi_reduction <add>, %74, %cst_31 [0] : vector<2x3x256xf32> to vector<3x256xf32>
    %89 = arith.addf %87, %88 : vector<3x256xf32>
    %c5_32 = arith.constant 5 : index
    %c0_33 = arith.constant 0 : index
    %90 = vector.load %arg5[%c5_32, %c0_33] : memref<8x256xf32, #tpu.memory_space<vmem>>, vector<3x256xf32>
    tpu.vector_store %arg5[%c5_32, %c0_33], %89 {strides = array<i32>} : memref<8x256xf32, #tpu.memory_space<vmem>>, vector<3x256xf32>,
    %c0_i32_34 = arith.constant 0 : i32
    %91 = arith.cmpi eq, %arg1, %c0_i32_34 : i32
    %92 = arith.extui %91 : i1 to i32
    %c0_i32_35 = arith.constant 0 : i32
    %93 = arith.cmpi ne, %92, %c0_i32_35 : i32
    scf.if %93 {
      %c0_36 = arith.constant 0 : index
      %c0_37 = arith.constant 0 : index
      %94 = vector.load %arg5[%c0_36, %c0_37] : memref<8x256xf32, #tpu.memory_space<vmem>>, vector<8x256xf32>
      %95 = vector.shape_cast %94 : vector<8x256xf32> to vector<1x8x256xf32>
      %cst_38 = arith.constant dense<0.000000e+00> : vector<1xf32>
      %96 = vector.multi_reduction <add>, %95, %cst_38 [1, 2] : vector<1x8x256xf32> to vector<1xf32>
      %97 = vector.shape_cast %96 : vector<1xf32> to vector<1x1x1xf32>
      %98 = vector.extract %97[0, 0, 0] : f32 from vector<1x1x1xf32>
      %99 = vector.broadcast %98 : f32 to vector<1x8x128xf32>
      %c0_39 = arith.constant 0 : index
      %c0_40 = arith.constant 0 : index
      %c0_41 = arith.constant 0 : index
      %100 = vector.load %arg4[%c0_39, %c0_40, %c0_41] : memref<1x8x128xf32, #tpu.memory_space<vmem>>, vector<1x8x128xf32>
      tpu.vector_store %arg4[%c0_39, %c0_40, %c0_41], %99 {strides = array<i32>} : memref<1x8x128xf32, #tpu.memory_space<vmem>>, vector<1x8x128xf32>,
    } else {
    }
    return
  }
  func.func @transform_0(%arg0: i32, %arg1: i32) -> (i32, i32, i32) {
    %c1_i32 = arith.constant 1 : i32
    %0 = arith.muli %arg0, %c1_i32 : i32
    %1 = arith.addi %0, %arg1 : i32
    %c0_i32 = arith.constant 0 : i32
    %c0_i32_0 = arith.constant 0 : i32
    %c0_i32_1 = arith.constant 0 : i32
    return %1, %c0_i32, %c0_i32_0 : i32, i32, i32
  }
  func.func @transform_1(%arg0: i32, %arg1: i32) -> (i32, i32, i32) {
    %c1_i32 = arith.constant 1 : i32
    %0 = arith.muli %arg0, %c1_i32 : i32
    %1 = arith.addi %0, %arg1 : i32
    %c0_i32 = arith.constant 0 : i32
    %c0_i32_0 = arith.constant 0 : i32
    %c0_i32_1 = arith.constant 0 : i32
    return %1, %c0_i32, %c0_i32_0 : i32, i32, i32
  }
  func.func @transform_2(%arg0: i32, %arg1: i32) -> (i32, i32, i32) {
    %c0_i32 = arith.constant 0 : i32
    %c0_i32_0 = arith.constant 0 : i32
    %c0_i32_1 = arith.constant 0 : i32
    return %arg0, %c0_i32, %c0_i32_0 : i32, i32, i32
  }
}

</mosaic_0001>

<bundles_post_ra>
// kernel: tpu_custom_call.1
= control target key start
LH: loop header
LB: loop body
LE: loop exit
PB: predicated region body
PF: predicated region fallthrough
CT: control target
= control target key end

     0   :  { %7 = vsyncpa [#allocation4], 0  ;;  %s1544_s0 = inlined_call_operand.hbm [shape: f32[4,8,256], index: 0, kind: input, shape index: {}]   ;;  %s1545_s1 = inlined_call_operand.hbm [shape: f32[4,8,256], index: 1, kind: input, shape index: {}]   ;;  %s1546_s2 = inlined_call_operand.hbm [shape: f32[2,8,128], index: 2, kind: output, shape index: {}]  }
   0x1   :  { %9 = vsyncpa [#allocation4 + $0x1], 0 }
   0x2   :  { %10 = vsyncpa [#allocation7], 0 }
   0x3   :  { %12 = vsyncpa [#allocation7 + $0x1], 0 }
   0x4   :  { %13 = vsyncpa [#allocation5], 0 }
   0x5   :  { %15 = vsyncpa [#allocation5 + $0x1], 0  ;;  %s1062_s9 = smov 0   ;;  %s1064_s10 = smov 0  }
   0x6   :  { %s1066_s11 = smov 0   ;;  %s1068_s12 = smov 0  }
   0x7   :  { %s1070_s13 = smov 0   ;;  %s1072_s14 = smov 0  }
   0x8 LB: > { %s743_s15 = sadd.s32 4294967295, %s1038_s14   ;;  %s744_s16 = sadd.s32 4294967294, %s1038_s14   ;;  %s1038_s14 = sphi %s1072_s14, %s21_s14   ;;  %s1034_s13 = sphi %s1070_s13, %s1564_s13   ;;  %s1030_s12 = sphi %s1068_s12, %s1563_s12   ;;  %s1026_s11 = sphi %s1066_s11, %s1562_s11   ;;  %s1022_s10 = sphi %s1064_s10, %s1561_s10   ;;  %s1018_s9 = sphi %s1062_s9, %s1560_s9  }
   0x9   : > { %s33_s17 = sadd.s32 1, %s1034_s13  ;;  %s42_s18 = sadd.s32 1, %s1026_s11 }
   0xa   : > { %p35_p0 = scmp.ge.s32.totalorder %s33_s17, 2  ;;  %p49_p1 = scmp.ne.s32.totalorder %s1026_s11, %s1022_s10 }
   0xb   : > { %p50_p2 = scmp.eq.s32.totalorder %s1038_s14, 0  ;;  %p55_p3 = scmp.ne.s32.totalorder %s1022_s10, %s1018_s9 }
   0xc   : > { %s1566_s17 = smov (%p35_p0, %s33_s17), 0  ;;  %p56_p5 = scmp.eq.s32.totalorder %s743_s15, 0 }
   0xd   : > { %p1103_p4 = por %p50_p2, %p49_p1  ;;  %s39_s20 = ssub.s32 %s1034_s13, %s1566_s17 }
   0xe   : > { %p107_p6 = scmp.eq.s32.totalorder %s743_s15, 1  ;;  %p40_p7 = scmp.eq.s32.totalorder %s39_s20, 0 }
   0xf   : > { %p1109_p8 = por %p56_p5, %p55_p3  ;;  %p113_p10 = scmp.eq.s32.totalorder %s744_s16, 1 }
  0x10   : > { %p1113_p9 = por %p107_p6, %p49_p1  ;;  %p806_p13 = scmp.lt.s32.totalorder %s1038_s14, 2 }
  0x11   : > { %s1550_s21 = scalar_select %p1109_p8, 1, 0 }
  0x12   : > { %s1551_s22 = scalar_select %p1113_p9, 1, 0 }
  0x13   : > { %s1118_s23 = scalar_select %p40_p7, %s1026_s11, %s42_s18  }
  0x14   : > { %p1120_p11 = por %p113_p10, %p55_p3  ;;  %s1127_s25 = sand.u32 1, %s1026_s11  }
  0x15   : > { %s747_s26 = sshll.u32 %s1127_s25, 5  ;;  %s776_s27 = sshll.u32 %s1034_s13, 9 }
  0x16   : > { %s1552_s24 = scalar_select %p1120_p11, 1, 0 }
  0x17   : > { %s1136_s30 = scalar_lea.hbm %s1544_s0, %s776_s27  ;;  %s137_s3 = scalar_lea.vmem [#allocation3], %s747_s26 }
  0x18   : > { %s146_s4 = sshll.u32 %s137_s3, 4  ;;  %p1144_p0 = pnand %p806_p13, %p1103_p4  ;;  %s1140_s4 = int_to_ptr.vmem [resolvable:$true] %s146_s4 }
  0x19   : > { %s134_s6 = scalar_lea.sflag [#allocation4], %s1127_s25  ;;  %s892_s7 = scalar_lea.hbm %s1136_s30, 512 }
  0x1a   : > { %p893_p2 = scmp.ne.s32.totalorder %s1136_s30, %s892_s7  ;;  %p894_p3 = pneg %p1144_p0 }
  0x1b   : > { %s897_s16 = scalar_lea.hbm %s1544_s0, 1024  ;;  %p898_p4 = scmp.lt.u32.totalorder %s1136_s30, %s1544_s0 }
  0x1c   : > { %p895_p5 = pnand %p894_p3, %p893_p2  ;;  %p899_p7 = scmp.lt.u32.totalorder %s897_s16, %s892_s7 }
  0x1d   : > { %p901_p13 = scmp.lt.u32.totalorder %s892_s7, %s1136_s30 }
  0x1e   : > { %p896_p6 = pneg %p895_p5  ;;  %p900_p10 = por %p899_p7, %p898_p4 }
  0x20   : > { %p902_p12 = por %p901_p13, %p900_p10 }
  0x22   : > { %p903_p1 = pnand %p902_p12, %p896_p6 }
  0x24   : > { %906 = shalt.err (!%p903_p1)
}
  0x25   : > { %s907_s20 = scalar_lea.vmem %s1140_s4, 512  ;;  %s1040_s28 = smov [#allocation3]  }
  0x26   : > { %p908_p2 = scmp.ne.s32.totalorder %s1140_s4, %s907_s20  ;;  %s912_s29 = sshll.u32 %s1040_s28, 4  ;;  %s913_s29 = int_to_ptr.vmem [resolvable:$false] %s912_s29 }
  0x27   : > { %s914_s3 = scalar_lea.vmem %s913_s29, 1024  ;;  %p915_p9 = scmp.lt.s32.totalorder %s1140_s4, %s913_s29 }
  0x28   : > { %p910_p5 = pnand %p908_p2, %p894_p3  ;;  %p916_p4 = scmp.lt.s32.totalorder %s914_s3, %s907_s20 }
  0x2a   : > { %p911_p11 = pneg %p910_p5  ;;  %p917_p7 = por %p916_p4, %p915_p9 }
  0x2c   : > { %p918_p10 = pnand %p917_p7, %p911_p11 }
  0x2e   : > { %921 = shalt.err (!%p918_p10)
}
  0x2f   : > { %s1041_s7 = smov 256   ;;  %s1042_s8 = smov 16  }
  0x30   : > { %798 = dma.hbm_to_vmem [thread:$0]  (!%p1144_p0), %s1136_s30, 512, %s1140_s4, %s134_s6, %s1041_s7, %s1041_s7, %s1042_s8  }
  0x31   : > { %p177_p9 = scmp.lt.s32.totalorder %s1038_s14, 3  ;;  %s1186_s18 = scalar_lea.hbm %s1545_s1, %s776_s27 }
  0x32   : > { %p1554_p11 = scmp.ge.s32.totalorder %s1038_s14, 1  ;;  %s160_s20 = scalar_lea.vmem [#allocation6], %s747_s26 }
  0x33   : > { %s169_s28 = sshll.u32 %s160_s20, 4  ;;  %s157_s30 = scalar_lea.sflag [#allocation7], %s1127_s25  ;;  %s1196_s28 = int_to_ptr.vmem [resolvable:$true] %s169_s28 }
  0x34   : > { %p1190_p12 = pnand %p1554_p11, %p177_p9  ;;  %s922_s4 = scalar_lea.hbm %s1186_s18, 512 }
  0x35   : > { %p923_p1 = scmp.ne.s32.totalorder %s1186_s18, %s922_s4  ;;  %s927_s29 = scalar_lea.hbm %s1545_s1, 1024 }
  0x36   : > { %p928_p2 = scmp.lt.u32.totalorder %s1186_s18, %s1545_s1  ;;  %p929_p5 = scmp.lt.u32.totalorder %s927_s29, %s922_s4 }
  0x37   : > { %p925_p6 = pnand %p923_p1, %p894_p3  ;;  %p931_p7 = scmp.lt.u32.totalorder %s922_s4, %s1186_s18 }
  0x38   : > { %p930_p4 = por %p929_p5, %p928_p2 }
  0x39   : > { %p926_p13 = pneg %p925_p6 }
  0x3a   : > { %p932_p10 = por %p931_p7, %p930_p4 }
  0x3c   : > { %p933_p9 = pnand %p932_p10, %p926_p13 }
  0x3e   : > { %936 = shalt.err (!%p933_p9)
}
  0x3f   : > { %s937_s26 = scalar_lea.vmem %s1196_s28, 512  ;;  %s1043_s16 = smov [#allocation6]  }
  0x40   : > { %p938_p11 = scmp.ne.s32.totalorder %s1196_s28, %s937_s26  ;;  %s942_s20 = sshll.u32 %s1043_s16, 4  ;;  %s943_s20 = int_to_ptr.vmem [resolvable:$false] %s942_s20 }
  0x41   : > { %s944_s27 = scalar_lea.vmem %s943_s20, 1024  ;;  %p945_p8 = scmp.lt.s32.totalorder %s1196_s28, %s943_s20 }
  0x42   : > { %p940_p1 = pnand %p938_p11, %p894_p3  ;;  %p946_p2 = scmp.lt.s32.totalorder %s944_s27, %s937_s26 }
  0x44   : > { %p941_p6 = pneg %p940_p1  ;;  %p947_p5 = por %p946_p2, %p945_p8 }
  0x46   : > { %p948_p4 = pnand %p947_p5, %p941_p6 }
  0x48   : > { %951 = shalt.err (!%p948_p4)
}
  0x49   : > { %801 = dma.hbm_to_vmem [thread:$0]  (!%p1144_p0), %s1186_s18, 512, %s1196_s28, %s157_s30, %s1041_s7, %s1041_s7, %s1042_s8  }
  0x4a   : > { %181 = sbr.rel (%p1190_p12) target bundleno = 388 (0x184), region = 28  ;;  %s1230_s4 = sand.u32 (!%p1190_p12), 1, %s1022_s10  }
  0x4b   : > { %s756_s6 = sshll.u32 (!%p1190_p12), %s1230_s4, 5  ;;  %s184_s29 = scalar_lea.sflag (!%p1190_p12), [#allocation4], %s1230_s4 }
  0x4c   : > { %s187_s5 = scalar_lea.vmem (!%p1190_p12), [#allocation3], %s756_s6  ;;  %p1556_p8 = scmp.ne.s32.totalorder (!%p1190_p12), %s1550_s21, 0 }
  0x51   : > { %1005 = dma.done.wait (%p1556_p8), %s184_s29, 512  }
  0x52   : > { %1007 = vsyncadd (%p1556_p8), %s184_s29, 4294966784  ;;  %s193_s25 = scalar_lea.sflag [#allocation7], %s1230_s4  ;;  %s1239_s7 = scalar_lea.vmem [#allocation6], %s756_s6 }
  0x53   : > { %1009 = dma.done.wait (%p1556_p8), %s193_s25, 512  }
  0x54   : > { %1011 = vsyncadd (%p1556_p8), %s193_s25, 4294966784  ;;  %v382_v0 = vlaneseq  ;;  %v1044_v1 = vmov 0.0   ;;  %v1045_v2 = vmov 1966171168   ;;  %vm264_vm0 = vcmask 1047557   ;;  %v1250_v6 = vld [vmem:[%s187_s5] sm:$0xff] }
  0x55   : > { %230 = vst [vmem:[#allocation2] sm:$0xff] %v1044_v1  ;;  %231 = vst [vmem:[#allocation2 + $0x8] sm:$0xff] %v1044_v1  ;;  %v575_v3 = vunpack.c.l.s4 %v1045_v2  ;;  %v1252_v7 = vld [vmem:[%s187_s5 + $0x8] sm:$0xff]  ;;  %v1254_v8 = vld [vmem:[%s187_s5 + $0x10] sm:$0xff]  ;;  %v759_v10 = vmul.f32 -1.442695, %v1250_v6 }
  0x56   : > { %v1248_v4 = vshrl.u32 %v382_v0, 7  ;;  %v1256_v9 = vld [vmem:[%s187_s5 + $0x18] sm:$0xff]  ;;  %v265_v11 = vsel %vm264_vm0, %v1250_v6, -inf  ;;  %v760_v13 = vmul.f32 -1.442695, %v1252_v7  ;;  %v272_v19 = vsel %vm264_vm0, %v1252_v7, -inf }
  0x57   : > { %v576_v5 = vunpack.c.0.s8 %v575_v3  ;;  %v761_v14 = vmul.f32 -1.442695, %v1254_v8  ;;  %860 = vpow2.f32 %v759_v10  ;;  %v762_v17 = vmul.f32 -1.442695, %v1256_v9  ;;  %v1280_v23 = vld [vmem:[%s1239_s7] sm:$0xff]  ;;  %v1283_v24 = vld [vmem:[%s1239_s7 + $0x8] sm:$0xff] }
  0x58   : > { %v1262_v12 = vsub.s32 4, %v1248_v4  ;;  %v1267_v15 = vsub.s32 6, %v1248_v4  ;;  %v266_v18 = vrot.slane %v265_v11, 4  ;;  %862 = vpow2.f32 %v760_v13  ;;  %v1286_v28 = vld [vmem:[%s1239_s7 + $0x10] sm:$0xff]  ;;  %v1291_v30 = vld [vmem:[%s1239_s7 + $0x18] sm:$0xff]  ;;  %s758_s21 = sshll.u32 %s1230_s4, 3 }
  0x59   : > { %v1270_v16 = vsub.s32 %v576_v5, %v1248_v4  ;;  %v273_v20 = vrot.slane %v272_v19, 4  ;;  %v279_v21 = vsel %vm264_vm0, %v1254_v8, -inf  ;;  %v286_v22 = vsel %vm264_vm0, %v1256_v9, -inf  ;;  %s221_s8 = scalar_lea.vmem [#allocation8], %s758_s21  ;;  %s772_s19 = sshll.u32 %s1030_s12, 7 }
  0x5a   : > { %864 = vpow2.f32 %v761_v14  ;;  %v267_v25 = vmax.f32 %v265_v11, %v266_v18  ;;  %v280_v26 = vrot.slane %v279_v21, 4  ;;  %v287_v27 = vrot.slane %v286_v22, 4  ;;  %s640_s18 = sshll.u32 %s221_s8, 4  ;;  %s1497_s15 = scalar_lea.hbm %s1546_s2, %s772_s19  ;;  %s1492_s18 = int_to_ptr.vmem [resolvable:$true] %s640_s18 }
  0x5b   : > { %866 = vpow2.f32 %v762_v17  ;;  %v274_v29 = vmax.f32 %v272_v19, %v273_v20  ;;  %vm354_vm1 = vcmp.eq.f32.partialorder %v1280_v23, 0.0  ;;  %vm355_vm2 = vcmp.eq.f32.partialorder %v1283_v24, 0.0  ;;  %s627_s26 = scalar_lea.sflag [#allocation5], %s1230_s4  ;;  %s952_s16 = scalar_lea.vmem %s1492_s18, 128 }
  0x5c   : > { %v268_v31 = vrot.slane %v267_v25, 2  ;;  %v281_v32 = vmax.f32 %v279_v21, %v280_v26  ;;  %v288_v33 = vmax.f32 %v286_v22, %v287_v27  ;;  %vm356_vm3 = vcmp.eq.f32.partialorder %v1286_v28, 0.0  ;;  %p953_p0 = scmp.ne.s32.totalorder %s1492_s18, %s952_s16  ;;  %p1557_p3 = scmp.ne.s32.totalorder %s1551_s22, 0 }
  0x5d   : > { %v275_v34 = vrot.slane %v274_v29, 2  ;;  %vm357_vm4 = vcmp.eq.f32.partialorder %v1291_v30, 0.0  ;;  %v779_v35 = vtrunc.f32 %v1280_v23  ;;  %v781_v36 = vtrunc.f32 %v1283_v24  ;;  %s1046_s12 = smov [#allocation8]  }
  0x5e   : > { %v269_v37 = vmax.f32 %v267_v25, %v268_v31  ;;  %v282_v38 = vrot.slane %v281_v32, 2  ;;  %v289_v39 = vrot.slane %v288_v33, 2  ;;  %v1298_v40 = vsel %vm354_vm1, 1.0, %v1044_v1  ;;  %p954_p12 = pnand %p953_p0, %p1557_p3  ;;  %s956_s20 = sshll.u32 %s1046_s12, 4  ;;  %s957_s20 = int_to_ptr.vmem [resolvable:$false] %s956_s20 }
  0x5f   : > { %v276_v41 = vmax.f32 %v274_v29, %v275_v34  ;;  %v1301_v42 = vsel %vm355_vm2, 1.0, %v1044_v1  ;;  %v1304_v43 = vsel %vm356_vm3, 1.0, %v1044_v1  ;;  %vm366_vm5 = vcmp.eq.f32.partialorder %v1280_v23, 1.0  ;;  %s958_s27 = scalar_lea.vmem %s957_s20, 256  ;;  %p959_p7 = scmp.lt.s32.totalorder %s1492_s18, %s957_s20 }
  0x60   : > { %v270_v44 = vrot.slane %v269_v37, 1  ;;  %v283_v45 = vmax.f32 %v281_v32, %v282_v38  ;;  %v290_v46 = vmax.f32 %v288_v33, %v289_v39  ;;  %vm367_vm6 = vcmp.eq.f32.partialorder %v1283_v24, 1.0  ;;  %p955_p13 = pneg %p954_p12  ;;  %p960_p10 = scmp.lt.s32.totalorder %s958_s27, %s952_s16 }
  0x61   : > { %v277_v47 = vrot.slane %v276_v41, 1  ;;  %v1311_v48 = vsel %vm357_vm4, 1.0, %v1044_v1  ;;  %vm368_vm7 = vcmp.eq.f32.partialorder %v1286_v28, 1.0  ;;  %vm369_vm8 = vcmp.eq.f32.partialorder %v1291_v30, 1.0  ;;  %v861_v49 = vpop.eup %860 }
  0x62   : > { %v271_v50 = vmax.f32 %v269_v37, %v270_v44  ;;  %v284_v51 = vrot.slane %v283_v45, 1  ;;  %v291_v52 = vrot.slane %v290_v46, 1  ;;  %v1316_v53 = vsel %vm366_vm5, 1.0, %v1044_v1  ;;  %v863_v54 = vpop.eup %862  ;;  %p961_p9 = por %p960_p10, %p959_p7 }
  0x63   : > { %v252_v55 = vadd.f32 1.0, %v861_v49  ;;  %v278_v56 = vmax.f32 %v276_v41, %v277_v47  ;;  %v768_v57 = vsel %vm367_vm6, 1.0, %v1044_v1  ;;  %v780_v58 = vcvt.f32.s32 %v779_v35 }
  0x64   : > { %v865_v59 = vpop.eup %864  ;;  %v253_v60 = vadd.f32 1.0, %v863_v54  ;;  %v285_v61 = vmax.f32 %v283_v45, %v284_v51  ;;  %v292_v62 = vmax.f32 %v290_v46, %v291_v52  ;;  %v293_v63 = vsub.f32 %v1250_v6, %v271_v50  ;;  %p962_p11 = pnand %p961_p9, %p955_p13 }
  0x65   : > { %v867_v2 = vpop.eup %866  ;;  %v254_v3 = vadd.f32 1.0, %v865_v59  ;;  %868 = vrcp.f32 %v252_v55  ;;  %v294_v5 = vsub.f32 %v1252_v7, %v278_v56  ;;  %v782_v10 = vcvt.f32.s32 %v781_v36 }
  0x66   : > { %v255_v11 = vadd.f32 1.0, %v867_v2  ;;  %870 = vrcp.f32 %v253_v60  ;;  %v295_v13 = vsub.f32 %v1254_v8, %v285_v61  ;;  %v296_v14 = vsub.f32 %v1256_v9, %v292_v62 }
  0x67   : > { %872 = vrcp.f32 %v254_v3  ;;  %v297_v17 = vmul.f32 1.442695, %v293_v63  ;;  %v299_v18 = vmul.f32 1.442695, %v294_v5  ;;  %v783_v19 = vtrunc.f32 %v1286_v28 }
  0x68   : > { %874 = vrcp.f32 %v255_v11  ;;  %v301_v20 = vmul.f32 1.442695, %v295_v13  ;;  %v303_v21 = vmul.f32 1.442695, %v296_v14  ;;  %v785_v22 = vtrunc.f32 %v1291_v30 }
  0x69   : > { %876 = vpow2.f32 %v297_v17  ;;  %v784_v25 = vcvt.f32.s32 %v783_v19  ;;  %v387_v26 = vrot.slane %v780_v58, %v1262_v12  ;;  %v391_v27 = vrot.slane %v782_v10, %v1262_v12 }
  0x6a   : > { %878 = vpow2.f32 %v299_v18  ;;  %v769_v29 = vsel %vm368_vm7, 1.0, %v1044_v1  ;;  %v770_v31 = vsel %vm369_vm8, 1.0, %v1044_v1  ;;  %v786_v32 = vcvt.f32.s32 %v785_v22 }
  0x6b   : > { %880 = vpow2.f32 %v301_v20  ;;  %vm317_vm9 = vcmask 1042432   ;;  %v395_v33 = vrot.slane %v784_v25, %v1262_v12  ;;  %vm400_vm10 = vcmp.eq.s32.totalorder %v1248_v4, %v387_v26 }
  0x6c   : > { %vm401_vm11 = vcmp.eq.s32.totalorder %v1248_v4, %v391_v27  ;;  %882 = vpow2.f32 %v303_v21  ;;  %v399_v34 = vrot.slane %v786_v32, %v1262_v12  ;;  %v1339_v35 = vrot.slane %v1316_v53, %v1267_v15 }
  0x6d   : > { %v1342_v36 = vrot.slane %v768_v57, %v1267_v15  ;;  %vm402_vm12 = vcmp.eq.s32.totalorder %v1248_v4, %v395_v33  ;;  %v1346_v37 = vsel %vm400_vm10, 1.0, %v1044_v1  ;;  %v1349_v38 = vsel %vm401_vm11, 1.0, %v1044_v1 }
  0x6e   : > { %v436_v39 = vsub.f32 %v1250_v6, %v1280_v23  ;;  %vm403_vm13 = vcmp.eq.s32.totalorder %v1248_v4, %v399_v34  ;;  %v1355_v12 = vrot.slane %v769_v29, %v1267_v15  ;;  %v437_v41 = vsub.f32 %v1252_v7, %v1283_v24 }
  0x6f   : > { %v438_v44 = vsub.f32 %v1254_v8, %v1286_v28  ;;  %v1361_v45 = vpop.eup %868  ;;  %v1364_v46 = vsel %vm402_vm12, 1.0, %v1044_v1  ;;  %v1367_v47 = vrot.slane %v770_v31, %v1267_v15  ;;  %v439_v4 = vsub.f32 %v1256_v9, %v1291_v30 }
  0x70   : > { %v440_v6 = vmul.f32 %v436_v39, %v436_v39  ;;  %v1371_v49 = vpop.eup %870  ;;  %v1374_v50 = vsel %vm403_vm13, 1.0, %v1044_v1  ;;  %v408_v7 = vsub.f32 %v1361_v45, %v1280_v23  ;;  %v441_v8 = vmul.f32 %v437_v41, %v437_v41 }
  0x71   : > { %v442_v51 = vmul.f32 %v438_v44, %v438_v44  ;;  %v1378_v52 = vpop.eup %872  ;;  %v409_v15 = vsub.f32 %v1371_v49, %v1283_v24  ;;  %v1382_v54 = vmul.f32 %v439_v4, %v439_v4  ;;  %v1385_v9 = vmul.f32 5.0, %v1316_v53 }
  0x72   : > { %v1387_v55 = vmul.f32 5.0, %v768_v57  ;;  %v1389_v56 = vpop.eup %874  ;;  %v410_v1 = vsub.f32 %v1378_v52, %v1286_v28  ;;  %v412_v58 = vmul.f32 %v408_v7, %v408_v7  ;;  %v1394_v59 = vmul.f32 %v440_v6, %v1339_v35 }
  0x73   : > { %v450_v60 = vmul.f32 5.0, %v769_v29  ;;  %v1396_v61 = vpop.eup %876  ;;  %v411_v62 = vsub.f32 %v1389_v56, %v1291_v30  ;;  %v413_v63 = vmul.f32 %v409_v15, %v409_v15  ;;  %v1401_v53 = vmul.f32 %v441_v8, %v1342_v36 }
  0x74   : > { %v1404_v57 = vmul.f32 %v442_v51, %v1355_v12  ;;  %v1406_v2 = vpop.eup %878  ;;  %v309_v3 = vrot.slane %v1396_v61, 5  ;;  %v414_v5 = vmul.f32 %v410_v1, %v410_v1  ;;  %v451_v10 = vmul.f32 5.0, %v770_v31 }
  0x75   : > { %v456_v11 = vrot.slane %v1280_v23, 1  ;;  %v1410_v13 = vpop.eup %880  ;;  %v310_v14 = vrot.slane %v1406_v2, 5  ;;  %v1413_v17 = vmul.f32 %v411_v62, %v411_v62  ;;  %v1416_v18 = vmul.f32 %v1339_v35, %v412_v58 }
  0x76   : > { %v457_v19 = vrot.slane %v1283_v24, 1  ;;  %v1419_v20 = vpop.eup %882  ;;  %v311_v21 = vrot.slane %v1410_v13, 5  ;;  %v318_v22 = vsel %vm317_vm9, %v309_v3, 0.0  ;;  %v1424_v25 = vmul.f32 %v1342_v36, %v413_v63 }
  0x77   : > { %v458_v23 = vrot.slane %v1286_v28, 1  ;;  %v312_v26 = vrot.slane %v1419_v20, 5  ;;  %v319_v27 = vrot.slane %v318_v22, 4  ;;  %v325_v29 = vsel %vm317_vm9, %v310_v14, 0.0 }
  0x78   : > { %v1430_v31 = vmul.f32 %v1355_v12, %v414_v5  ;;  %v326_v24 = vrot.slane %v325_v29, 4  ;;  %v332_v32 = vsel %vm317_vm9, %v311_v21, 0.0  ;;  %v459_v33 = vrot.slane %v1291_v30, 1 }
  0x79   : > { %v464_v34 = vsub.f32 %v1361_v45, %v456_v11  ;;  %v320_v39 = vadd.f32 %v319_v27, %v318_v22  ;;  %v333_v41 = vrot.slane %v332_v32, 4  ;;  %v339_v44 = vsel %vm317_vm9, %v312_v26, 0.0 }
  0x7a   : > { %v465_v28 = vsub.f32 %v1371_v49, %v457_v19  ;;  %v327_v4 = vadd.f32 %v326_v24, %v325_v29  ;;  %v340_v6 = vrot.slane %v339_v44, 4  ;;  %v466_v7 = vsub.f32 %v1378_v52, %v458_v23 }
  0x7b   : > { %v467_v8 = vsub.f32 %v1389_v56, %v459_v33  ;;  %v321_v51 = vrot.slane %v320_v39, 2  ;;  %v334_v15 = vadd.f32 %v333_v41, %v332_v32  ;;  %v468_v1 = vmul.f32 %v464_v34, %v464_v34 }
  0x7c   : > { %v469_v58 = vmul.f32 %v465_v28, %v465_v28  ;;  %v328_v62 = vrot.slane %v327_v4, 2  ;;  %v341_v30 = vadd.f32 %v340_v6, %v339_v44  ;;  %v470_v63 = vmul.f32 %v466_v7, %v466_v7 }
  0x7d   : > { %v471_v3 = vmul.f32 %v467_v8, %v467_v8  ;;  %v322_v5 = vadd.f32 %v321_v51, %v320_v39  ;;  %v335_v11 = vrot.slane %v334_v15, 2  ;;  %v476_v14 = vrot.slane %v468_v1, 6 }
  0x7e   : > { %v477_v21 = vrot.slane %v469_v58, 6  ;;  %vm538_vm14 = vcmask 1041408   ;;  %v329_v19 = vadd.f32 %v328_v62, %v327_v4  ;;  %v342_v22 = vrot.slane %v341_v30, 2 }
  0x7f   : > { %v478_v26 = vrot.slane %v470_v63, 6  ;;  %v479_v27 = vrot.slane %v471_v3, 6  ;;  %vm551_vm15 = vcmask 1043458   ;;  %v323_v23 = vrot.slane %v322_v5, 1 }
  0x80   : > { %v336_v29 = vadd.f32 %v335_v11, %v334_v15  ;;  %v484_v24 = vmul.f32 %v476_v14, %v1385_v9  ;;  %v485_v32 = vmul.f32 %v477_v21, %v1387_v55  ;;  %v330_v33 = vrot.slane %v329_v19, 1  ;;  %v537_v11 = vld [vmem:[#allocation2 + $0x8] sm:$0x3] }
  0x81   : > { %v343_v34 = vadd.f32 %v342_v22, %v341_v30  ;;  %v486_v41 = vmul.f32 %v478_v26, %v450_v60  ;;  %v487_v44 = vmul.f32 %v479_v27, %v451_v10  ;;  %vm564_vm1 = vcmask 1046534   ;;  %v549_v22 = vld [vmem:[#allocation2] sm:$0xc]  ;;  %v550_v26 = vld [vmem:[#allocation2 + $0x8] sm:$0xc] }
  0x82   : > { %v324_v39 = vadd.f32 %v323_v23, %v322_v5  ;;  %v337_v28 = vrot.slane %v336_v29, 1  ;;  %v492_v6 = vrot.slane %v1361_v45, 6  ;;  %v493_v4 = vrot.slane %v1371_v49, 6  ;;  %v536_v5 = vld [vmem:[#allocation2] sm:$0x3] }
  0x83   : > { %v331_v7 = vadd.f32 %v330_v33, %v329_v19  ;;  %v344_v8 = vrot.slane %v343_v34, 1  ;;  %v494_v51 = vrot.slane %v1378_v52, 6  ;;  %v495_v15 = vrot.slane %v1389_v56, 6 }
  0x84   : > { %v338_v9 = vadd.f32 %v337_v28, %v336_v29  ;;  %884 = vrcp.f32 %v324_v39  ;;  %v500_v55 = vmul.f32 %v1298_v40, %v492_v6  ;;  %v501_v60 = vmul.f32 %v1301_v42, %v493_v4 }
  0x85   : > { %v345_v10 = vadd.f32 %v344_v8, %v343_v34  ;;  %886 = vrcp.f32 %v331_v7  ;;  %v502_v1 = vmul.f32 %v1304_v43, %v494_v51  ;;  %v503_v45 = vmul.f32 %v1311_v48, %v495_v15 }
  0x86   : > { %888 = vrcp.f32 %v338_v9  ;;  %v435_v49 = vmul.f32 %v1367_v47, %v1413_v17  ;;  %v504_v58 = vmul.f32 %v500_v55, %v492_v6  ;;  %v505_v52 = vmul.f32 %v501_v60, %v493_v4 }
  0x87   : > { %890 = vrcp.f32 %v345_v10  ;;  %v447_v56 = vmul.f32 %v1382_v54, %v1367_v47  ;;  %v506_v62 = vmul.f32 %v502_v1, %v494_v51  ;;  %v507_v40 = vmul.f32 %v503_v45, %v495_v15 }
  0x88   : > { %v508_v30 = vadd.f32 %v504_v58, %v484_v24  ;;  %v509_v42 = vadd.f32 %v505_v52, %v485_v32  ;;  %v516_v63 = vrot.slane %v1346_v37, 3  ;;  %v517_v43 = vrot.slane %v1349_v38, 3 }
  0x89   : > { %v510_v3 = vadd.f32 %v506_v62, %v486_v41  ;;  %v511_v48 = vadd.f32 %v507_v40, %v487_v44  ;;  %v539_v17 = vsel %vm538_vm14, %v1416_v18, 0.0  ;;  %v540_v14 = vsel %vm538_vm14, %v1430_v31, 0.0 }
  0x8a   : > { %v541_v21 = vadd.f32 %v540_v14, %v539_v17  ;;  %v542_v54 = vsel %vm538_vm14, %v1424_v25, 0.0  ;;  %v543_v19 = vsel %vm538_vm14, %v435_v49, 0.0  ;;  %v552_v37 = vsel %vm551_vm15, %v1394_v59, 0.0 }
  0x8b   : > { %v544_v38 = vadd.f32 %v543_v19, %v542_v54  ;;  %v553_v27 = vsel %vm551_vm15, %v1404_v57, 0.0  ;;  %v555_v18 = vsel %vm551_vm15, %v1401_v53, 0.0  ;;  %v556_v31 = vsel %vm551_vm15, %v447_v56, 0.0  ;;  %v563_v56 = vld [vmem:[#allocation2 + $0x4] ss:$8 sm:$0x3] }
  0x8c   : > { %v545_v23 = vadd.f32 %v541_v21, %v536_v5  ;;  %v554_v29 = vadd.f32 %v553_v27, %v552_v37  ;;  %v557_v24 = vadd.f32 %v556_v31, %v555_v18  ;;  %v565_v25 = vsel %vm564_vm1, %v508_v30, 0.0 }
  0x8d   : > { %v546_v32 = vadd.f32 %v544_v38, %v537_v11  ;;  %v566_v33 = vsel %vm564_vm1, %v510_v3, 0.0  ;;  %v568_v59 = vsel %vm564_vm1, %v509_v42, 0.0  ;;  %v569_v34 = vsel %vm564_vm1, %v511_v48, 0.0 }
  0x8e   : > { %v885_v41 = vpop.eup %884  ;;  %547 = vst [vmem:[#allocation2] sm:$0x3] %v545_v23  ;;  %v558_v57 = vadd.f32 %v554_v29, %v549_v22  ;;  %v559_v44 = vadd.f32 %v557_v24, %v550_v26  ;;  %v567_v39 = vadd.f32 %v566_v33, %v565_v25  ;;  %v570_v53 = vadd.f32 %v569_v34, %v568_v59 }
  0x8f   : > { %v887_v28 = vpop.eup %886  ;;  %v350_v6 = vmul.f32 %v885_v41, %v1396_v61  ;;  %v518_v4 = vrot.slane %v1364_v46, 3  ;;  %548 = vst [vmem:[#allocation2 + $0x8] sm:$0x3] %v546_v32  ;;  %v519_v51 = vrot.slane %v1374_v50, 3  ;;  %vm593_vm2 = vcmp.lt.s32.totalorder %v382_v0, 256 }
  0x90   : > { %v889_v7 = vpop.eup %888  ;;  %v351_v8 = vmul.f32 %v887_v28, %v1406_v2  ;;  %560 = vst [vmem:[#allocation2] sm:$0xc] %v558_v57  ;;  %561 = vst [vmem:[#allocation2 + $0x8] sm:$0xc] %v559_v44  ;;  %v573_v15 = vcombine.high %v567_v39, %v570_v53 }
  0x91   : > { %v891_v9 = vpop.eup %890  ;;  %v352_v55 = vmul.f32 %v889_v7, %v1410_v13  ;;  %v524_v60 = vsub.f32 %v350_v6, %v516_v63 }
  0x92   : > { %v353_v10 = vmul.f32 %v891_v9, %v1419_v20  ;;  %v525_v1 = vsub.f32 %v351_v8, %v517_v43  ;;  %v580_v61 = vrot.slane %v573_v15, %v1270_v16 }
  0x93   : > { %v526_v45 = vsub.f32 %v352_v55, %v518_v4  ;;  %v528_v46 = vmul.f32 %v524_v60, %v524_v60 }
  0x94   : > { %v527_v49 = vsub.f32 %v353_v10, %v519_v51  ;;  %v529_v58 = vmul.f32 %v525_v1, %v525_v1  ;;  %v587_v2 = vrot.slane %v580_v61, %v1270_v16  ;;  %v597_v16 = vld [vmem:[#allocation2] sm:$0xe0] }
  0x95   : > { %v530_v52 = vmul.f32 %v526_v45, %v526_v45  ;;  %v532_v50 = vmul.f32 %v528_v46, %v1339_v35  ;;  %v598_v35 = vld [vmem:[#allocation2 + $0x8] sm:$0xe0] }
  0x96   : > { %v531_v62 = vmul.f32 %v527_v49, %v527_v49  ;;  %v533_v40 = vmul.f32 %v529_v58, %v1342_v36  ;;  %v588_v13 = vcombine.high %v587_v2, %v587_v2 }
  0x97   : > { %v534_v30 = vmul.f32 %v530_v52, %v1355_v12  ;;  %v599_v20 = vsel %vm264_vm0, %v532_v50, 0.0 }
  0x98   : > { %v535_v42 = vmul.f32 %v531_v62, %v1367_v47  ;;  %v590_v63 = vadd.f32 %v588_v13, %v563_v56  ;;  %v602_v43 = vsel %vm264_vm0, %v533_v40, 0.0 }
  0x99   : > { %v600_v3 = vsel %vm264_vm0, %v534_v30, 0.0 }
  0x9a   : > { %595 = vst.msk [vmem:[#allocation2 + $0x4] ss:$8 sm:$0x3] %vm593_vm2, %v590_v63  ;;  %v601_v48 = vadd.f32 %v600_v3, %v599_v20  ;;  %v603_v36 = vsel %vm264_vm0, %v535_v42, 0.0 }
  0x9b   : > { %v604_v5 = vadd.f32 %v603_v36, %v602_v43 }
  0x9c   : > { %v605_v11 = vadd.f32 %v601_v48, %v597_v16 }
  0x9d   : > { %v606_v12 = vadd.f32 %v604_v5, %v598_v35 }
  0x9e   : > { %607 = vst [vmem:[#allocation2] sm:$0xe0] %v605_v11 }
  0x9f   : > { %608 = vst [vmem:[#allocation2 + $0x8] sm:$0xe0] %v606_v12 }
  0xa5   : > { %v612_v0 = vld [vmem:[#allocation2] sm:$0xff] }
  0xa6   : > { %v613_v47 = vld [vmem:[#allocation2 + $0x8] sm:$0xff] }
  0xa7   : > { %v614_v17 = vadd.f32 %v613_v47, %v612_v0 }
  0xa9   : > { %615 = vadd.xlane.f32.xlu0 %v614_v17 }
 0x136   : > { %v616_v14 = vpop.xlane.xlu0 %615 }
 0x137   : > { %v617_v21 = vrot.slane %v616_v14, 4 }
 0x139   : > { %v618_v54 = vadd.f32 %v617_v21, %v616_v14 }
 0x13b   : > { %v619_v19 = vrot.slane %v618_v54, 2 }
 0x13d   : > { %v620_v22 = vadd.f32 %v619_v19, %v618_v54 }
 0x13f   : > { %v621_v37 = vrot.slane %v620_v22, 1 }
 0x141   : > { %v622_v38 = vadd.f32 %v621_v37, %v620_v22 }
 0x143   : > { %787 = vpush %v622_v38 }
 0x174   : > { %s788_s28 = spop %787 }
 0x175   : > { %v624_v26 = vstv %s788_s28 }
 0x176   : > { %625 = vst [vmem:[%s221_s8] sm:$0xff] %v624_v26 }
 0x177   : > { %965 = shalt.err (!%p962_p11)
}
 0x178   : > { %s966_s4 = scalar_lea.hbm %s1497_s15, 128  ;;  %s970_s5 = scalar_lea.hbm %s1546_s2, 256 }
 0x179   : > { %p967_p1 = scmp.ne.s32.totalorder %s1497_s15, %s966_s4  ;;  %p971_p5 = scmp.lt.u32.totalorder %s1497_s15, %s1546_s2 }
 0x17a   : > { %p972_p4 = scmp.lt.u32.totalorder %s970_s5, %s966_s4  ;;  %p974_p0 = scmp.lt.u32.totalorder %s966_s4, %s1497_s15 }
 0x17b   : > { %p968_p6 = pnand %p967_p1, %p1557_p3 }
 0x17c   : > { %p973_p8 = por %p972_p4, %p971_p5 }
 0x17d   : > { %p969_p2 = pneg %p968_p6 }
 0x17e   : > { %p975_p12 = por %p974_p0, %p973_p8 }
 0x180   : > { %p976_p13 = pnand %p975_p12, %p969_p2 }
 0x182   : > { %979 = shalt.err (!%p976_p13)
}
 0x183   : > { %793 = dma.vmem_to_hbm [thread:$0]  (%p1557_p3), %s1492_s18, 128, %s1497_s15, %s627_s26  }
 0x184 PF: > { %s652_s21 = sand.u32 1, %s1018_s9   ;;  %p1558_p7 = scmp.ne.s32.totalorder %s1552_s24, 0 }
 0x185   : > { %p1559_p10 = scmp.ge.s32.totalorder %s1038_s14, 2  ;;  %s653_s8 = scalar_lea.sflag [#allocation5], %s652_s21 }
 0x187   : > { %p803_p9 = pnand %p1559_p10, %p1558_p7 }
 0x189   : > { %1013 = dma.done.wait (!%p803_p9), %s653_s8, 128  }
 0x18a   : > { %1015 = vsyncadd (!%p803_p9), %s653_s8, 4294967168  ;;  %s21_s14 = sadd.s32 1, %s1038_s14   ;;  %s1560_s9 = smov %s1022_s10 }
 0x18b   : > { %p18_p11 = scmp.ge.s32.totalorder %s21_s14, 4   ;;  %s1561_s10 = smov %s1026_s11 }
 0x18c   : > { %s1562_s11 = smov %s1118_s23  ;;  %s1563_s12 = smov %s1034_s13 }
 0x18d   : > { %s1564_s13 = smov %s1566_s17  ;;  %20 = sbr.rel (!%p18_p11) target bundleno = 8 (0x8), region = 95 }
 0x194   :  { %658 = vsyncpa [#allocation4], 1 }
 0x195   :  { %660 = vsyncpa [#allocation4 + $0x1], 1 }
 0x196   :  { %661 = vsyncpa [#allocation7], 1 }
 0x197   :  { %663 = vsyncpa [#allocation7 + $0x1], 1 }
 0x198   :  { %664 = vsyncpa [#allocation5], 1 }
 0x199   :  { %666 = vsyncpa [#allocation5 + $0x1], 1 }

</bundles_post_ra>
